<compile_context>
chip_gen: v5e
topology: v5e:2x2
jax: 0.10.0
libtpu: 0.0.40
codegen_flags: <defaults>
</compile_context>

<pallas_src>
import functools

import jax
import jax.numpy as jnp
from jax import lax
from jax.experimental import pallas as pl
from jax.experimental.pallas import tpu as pltpu


def atomic_nn_kernel(x_ref, w1_ref, b1_ref, w2_ref, b2_ref, w3_ref, b3_ref,
                     o_ref, *, out_is_single):
    """One atom-tile of the AtomicNN MLP; atoms live on the lane axis.

    x_ref : (TB, in_size) f32   (natural layout; transposed on-chip by the dot)
    w1_ref: (H1, in_size) bf16, b1_ref: (H1, 1) f32
    w2_ref: (H2, H1)      bf16, b2_ref: (H2, 1) f32
    w3_ref: (H2, out)     f32,  b3_ref: (out, 1) f32
    o_ref : (out, TB)     f32   (lane-dense output)
    """
    x = x_ref[...].astype(jnp.bfloat16)

    # layer 0: h = W1 @ x^T  -> (H1, TB); feature axis contracted on-chip so the
    # atom axis maps to lanes (no wrapper transpose of x needed).
    h = lax.dot_general(w1_ref[...], x,
                        dimension_numbers=(((1,), (1,)), ((), ())),
                        preferred_element_type=jnp.float32)
    h = jax.nn.sigmoid(h + b1_ref[...])            # f32 bias-add + sigmoid

    # layer 1: (H2, TB)
    h = jnp.dot(w2_ref[...], h.astype(jnp.bfloat16),
                preferred_element_type=jnp.float32)
    h = jax.nn.sigmoid(h + b2_ref[...])

    # output layer: with a single output row, skip the MXU entirely
    # (VPU broadcast-mul + XLU sublane reduce); otherwise contract on the MXU.
    if out_is_single:
        out = jnp.sum(w3_ref[...] * h, axis=0, keepdims=True) + b3_ref[...]
    else:
        out = lax.dot_general(w3_ref[...].astype(jnp.bfloat16),
                              h.astype(jnp.bfloat16),
                              dimension_numbers=(((0,), (0,)), ((), ())),
                              preferred_element_type=jnp.float32) + b3_ref[...]

    o_ref[...] = out.astype(o_ref.dtype)


@functools.partial(jax.jit, static_argnames=("tile_b",))
def atomic_nn_forward(x, params, *, tile_b=8192):
    """Run the fused AtomicNN MLP Pallas kernel.

    x      : (N, input_size) float32
    params : dict with w1 (H1,in), b1 (H1,), w2 (H2,H1), b2 (H2,),
             w3 (out,H2), b3 (out,)
    tile_b : atom tile size; multiple of 128.  Default 8192 keeps per-step
             double-buffered VMEM (~2-3 MiB) safely inside v7x's 64 MiB while
             amortizing per-grid-step pipeline overhead below ~2%.
    """
    n, in_size = x.shape
    w1, b1 = params["w1"], params["b1"]
    w2, b2 = params["w2"], params["b2"]
    w3, b3 = params["w3"], params["b3"]
    h1, h2, out_size = w1.shape[0], w2.shape[0], w3.shape[0]

    assert tile_b % 128 == 0, "tile_b must be a multiple of 128 (lane width)"

    # Pick the tile so the grid has >= 2 steps whenever N spans more than one
    # 128-lane chunk (keeps both v7x TensorCores busy), otherwise 128.
    n128 = -(-n // 128) * 128
    if n128 >= 256:
        two_way = -(-(n128 // 2) // 128) * 128     # ~half of N, rounded to 128
    else:
        two_way = 128
    tile = max(128, min(tile_b, two_way))
    grid = (pl.cdiv(n, tile),)                      # ragged tail handled by Pallas

    # Weights to bf16 (MXU operands); biases stay f32 as (H, 1) lane-broadcast
    # columns; w3 passed transposed as an (H2, out) column for the VPU path.
    w1b = w1.astype(jnp.bfloat16)
    w2b = w2.astype(jnp.bfloat16)
    w3t = w3.T                                      # (H2, out) f32
    b1c = b1.reshape(h1, 1)
    b2c = b2.reshape(h2, 1)
    b3c = b3.reshape(out_size, 1)

    # weights / biases: full-array blocks, same block at every grid step
    full = lambda shape: pl.BlockSpec(shape, lambda i: (0, 0))

    cost = pl.CostEstimate(
        flops=2 * n * (in_size * h1 + h1 * h2 + h2 * out_size),
        transcendentals=n * (h1 + h2),
        bytes_accessed=(4 * n * in_size + 4 * n * out_size
                        + 2 * (in_size * h1 + h1 * h2) + 4 * h2 * out_size
                        + 4 * (h1 + h2 + out_size)),
    )

    kernel = functools.partial(atomic_nn_kernel, out_is_single=(out_size == 1))

    out_t = pl.pallas_call(
        kernel,
        out_shape=jax.ShapeDtypeStruct((out_size, n), x.dtype),
        grid_spec=pltpu.PrefetchScalarGridSpec(
            num_scalar_prefetch=0,
            grid=grid,
            in_specs=[
                pl.BlockSpec((tile, in_size), lambda i: (i, 0)),   # x tile, natural layout
                full((h1, in_size)), full((h1, 1)),
                full((h2, h1)),      full((h2, 1)),
                full((h2, out_size)), full((out_size, 1)),
            ],
            out_specs=pl.BlockSpec((out_size, tile), lambda i: (0, i)),
        ),
        compiler_params=pltpu.CompilerParams(
            dimension_semantics=("parallel",)),
        cost_estimate=cost,
    )(x, w1b, b1c, w2b, b2c, w3t, b3c)

    # (out_size, N) -> (N, out_size); for out_size == 1 this is essentially a reshape.
    return out_t.T


def init_params(key, input_size, hidden_sizes, output_size=1):
    """Deterministic init matching nn.Linear default (uniform +/- 1/sqrt(fan_in))."""
    sizes = [input_size] + list(hidden_sizes) + [output_size]
    params = {}
    for li, (fan_in, fan_out) in enumerate(zip(sizes[:-1], sizes[1:]), start=1):
        key, kw, kb = jax.random.split(key, 3)
        bound = 1.0 / jnp.sqrt(fan_in)
        params[f"w{li}"] = jax.random.uniform(
            kw, (fan_out, fan_in), jnp.float32, -bound, bound)
        params[f"b{li}"] = jax.random.uniform(
            kb, (fan_out,), jnp.float32, -bound, bound)
    return params


def reference_forward(x, params):
    """Pure-JAX f32 reference of AtomicNN.forward (sigmoid hidden activations)."""
    h = jax.nn.sigmoid(x @ params["w1"].T + params["b1"])
    h = jax.nn.sigmoid(h @ params["w2"].T + params["b2"])
    return h @ params["w3"].T + params["b3"]


if __name__ == "__main__":
    # AtomicNN(input_size=16, hidden_sizes=[32, 32], output_size=1)
    input_size = 16
    hidden_sizes = [32, 32]
    output_size = 1
    n_atoms = 250  # not a multiple of 128: exercises the ragged-tail block path

    key = jax.random.PRNGKey(0)
    key, kx = jax.random.split(key)
    params = init_params(key, input_size, hidden_sizes, output_size)
    x = jax.random.normal(kx, (n_atoms, input_size), jnp.float32)

    y = atomic_nn_forward(x, params)
    y = jax.block_until_ready(y)

    y_ref = reference_forward(x, params)
    assert y.shape == (n_atoms, output_size)
    # bf16 MXU operands (f32 accumulation): expect ~1e-2-level deviation vs f32 ref.
    assert jnp.allclose(y, y_ref, atol=3e-2, rtol=3e-2), "mismatch vs reference"

    print("KERNEL_OK")
</pallas_src>

<mosaic_0001>
module attributes {stable_mosaic.version = 11 : i64} {
  func.func @atomic_nn_kernel(%arg0: i32, %arg1: memref<128x16xf32, #tpu.memory_space<vmem>>, %arg2: memref<32x16xbf16, #tpu.memory_space<vmem>>, %arg3: memref<32x1xf32, #tpu.memory_space<vmem>>, %arg4: memref<32x32xbf16, #tpu.memory_space<vmem>>, %arg5: memref<32x1xf32, #tpu.memory_space<vmem>>, %arg6: memref<32x1xf32, #tpu.memory_space<vmem>>, %arg7: memref<1x1xf32, #tpu.memory_space<vmem>>, %arg8: memref<1x128xf32, #tpu.memory_space<vmem>>) attributes {dimension_semantics = [#tpu.dimension_semantics<parallel>], iteration_bounds = array<i64: 2>, scalar_prefetch = 0 : i64, scratch_operands = 0 : i64, tpu.core_type = #tpu.core_type<tc>, window_params = [{transform_indices = @transform_0, window_bounds = array<i64: 128, 16>}, {pipeline_mode = #tpu.pipeline_mode<synchronous>, transform_indices = @transform_1, window_bounds = array<i64: 32, 16>}, {pipeline_mode = #tpu.pipeline_mode<synchronous>, transform_indices = @transform_2, window_bounds = array<i64: 32, 1>}, {pipeline_mode = #tpu.pipeline_mode<synchronous>, transform_indices = @transform_3, window_bounds = array<i64: 32, 32>}, {pipeline_mode = #tpu.pipeline_mode<synchronous>, transform_indices = @transform_4, window_bounds = array<i64: 32, 1>}, {pipeline_mode = #tpu.pipeline_mode<synchronous>, transform_indices = @transform_5, window_bounds = array<i64: 32, 1>}, {pipeline_mode = #tpu.pipeline_mode<synchronous>, transform_indices = @transform_6, window_bounds = array<i64: 1, 1>}, {transform_indices = @transform_7, window_bounds = array<i64: 1, 128>}]} {
    %c0 = arith.constant 0 : index
    %c0_0 = arith.constant 0 : index
    %0 = vector.load %arg1[%c0, %c0_0] : memref<128x16xf32, #tpu.memory_space<vmem>>, vector<128x16xf32>
    %1 = arith.truncf %0 : vector<128x16xf32> to vector<128x16xbf16>
    %c0_1 = arith.constant 0 : index
    %c0_2 = arith.constant 0 : index
    %2 = vector.load %arg2[%c0_1, %c0_2] : memref<32x16xbf16, #tpu.memory_space<vmem>>, vector<32x16xbf16>
    %cst = arith.constant dense<0.000000e+00> : vector<32x128xf32>
    %3 = tpu.matmul %2, %1, %cst {dimension_numbers = #tpu.dot_dimension_numbers<[1], [1], [0], [0], [0, 0, 1, 0], [], []>} : vector<32x16xbf16>, vector<128x16xbf16>, vector<32x128xf32> -> vector<32x128xf32>
    %c0_3 = arith.constant 0 : index
    %c0_4 = arith.constant 0 : index
    %4 = vector.load %arg3[%c0_3, %c0_4] : memref<32x1xf32, #tpu.memory_space<vmem>>, vector<32x1xf32>
    %5 = vector.broadcast %4 : vector<32x1xf32> to vector<32x128xf32>
    %6 = arith.addf %3, %5 : vector<32x128xf32>
    %7 = arith.negf %6 : vector<32x128xf32>
    %8 = math.exp %7 : vector<32x128xf32>
    %cst_5 = arith.constant 1.000000e+00 : f32
    %9 = vector.broadcast %cst_5 : f32 to vector<32x128xf32>
    %10 = arith.addf %9, %8 : vector<32x128xf32>
    %11 = arith.divf %9, %10 : vector<32x128xf32>
    %c0_6 = arith.constant 0 : index
    %c0_7 = arith.constant 0 : index
    %12 = vector.load %arg4[%c0_6, %c0_7] : memref<32x32xbf16, #tpu.memory_space<vmem>>, vector<32x32xbf16>
    %13 = arith.truncf %11 : vector<32x128xf32> to vector<32x128xbf16>
    %cst_8 = arith.constant dense<0.000000e+00> : vector<32x128xf32>
    %14 = tpu.matmul %12, %13, %cst_8 {dimension_numbers = #tpu.dot_dimension_numbers<[1], [0], [0], [1], [0, 0, 1, 1], [], []>} : vector<32x32xbf16>, vector<32x128xbf16>, vector<32x128xf32> -> vector<32x128xf32>
    %c0_9 = arith.constant 0 : index
    %c0_10 = arith.constant 0 : index
    %15 = vector.load %arg5[%c0_9, %c0_10] : memref<32x1xf32, #tpu.memory_space<vmem>>, vector<32x1xf32>
    %16 = vector.broadcast %15 : vector<32x1xf32> to vector<32x128xf32>
    %17 = arith.addf %14, %16 : vector<32x128xf32>
    %18 = arith.negf %17 : vector<32x128xf32>
    %19 = math.exp %18 : vector<32x128xf32>
    %cst_11 = arith.constant 1.000000e+00 : f32
    %20 = vector.broadcast %cst_11 : f32 to vector<32x128xf32>
    %21 = arith.addf %20, %19 : vector<32x128xf32>
    %22 = arith.divf %20, %21 : vector<32x128xf32>
    %c0_12 = arith.constant 0 : index
    %c0_13 = arith.constant 0 : index
    %23 = vector.load %arg6[%c0_12, %c0_13] : memref<32x1xf32, #tpu.memory_space<vmem>>, vector<32x1xf32>
    %24 = vector.broadcast %23 : vector<32x1xf32> to vector<32x128xf32>
    %25 = arith.mulf %24, %22 : vector<32x128xf32>
    %cst_14 = arith.constant dense<0.000000e+00> : vector<128xf32>
    %26 = vector.multi_reduction <add>, %25, %cst_14 [0] : vector<32x128xf32> to vector<128xf32>
    %27 = vector.shape_cast %26 : vector<128xf32> to vector<1x128xf32>
    %c0_15 = arith.constant 0 : index
    %c0_16 = arith.constant 0 : index
    %28 = vector.load %arg7[%c0_15, %c0_16] : memref<1x1xf32, #tpu.memory_space<vmem>>, vector<1x1xf32>
    %29 = vector.broadcast %28 : vector<1x1xf32> to vector<1x128xf32>
    %30 = arith.addf %27, %29 : vector<1x128xf32>
    %c0_17 = arith.constant 0 : index
    %c0_18 = arith.constant 0 : index
    %31 = vector.load %arg8[%c0_17, %c0_18] : memref<1x128xf32, #tpu.memory_space<vmem>>, vector<1x128xf32>
    tpu.vector_store %arg8[%c0_17, %c0_18], %30 {strides = array<i32>} : memref<1x128xf32, #tpu.memory_space<vmem>>, vector<1x128xf32>,
    return
  }
  func.func @transform_0(%arg0: i32) -> (i32, i32) {
    %c0_i32 = arith.constant 0 : i32
    %c0_i32_0 = arith.constant 0 : i32
    return %arg0, %c0_i32 : i32, i32
  }
  func.func @transform_1(%arg0: i32) -> (i32, i32) {
    %c0_i32 = arith.constant 0 : i32
    %c0_i32_0 = arith.constant 0 : i32
    %c0_i32_1 = arith.constant 0 : i32
    return %c0_i32, %c0_i32_0 : i32, i32
  }
  func.func @transform_2(%arg0: i32) -> (i32, i32) {
    %c0_i32 = arith.constant 0 : i32
    %c0_i32_0 = arith.constant 0 : i32
    %c0_i32_1 = arith.constant 0 : i32
    return %c0_i32, %c0_i32_0 : i32, i32
  }
  func.func @transform_3(%arg0: i32) -> (i32, i32) {
    %c0_i32 = arith.constant 0 : i32
    %c0_i32_0 = arith.constant 0 : i32
    %c0_i32_1 = arith.constant 0 : i32
    return %c0_i32, %c0_i32_0 : i32, i32
  }
  func.func @transform_4(%arg0: i32) -> (i32, i32) {
    %c0_i32 = arith.constant 0 : i32
    %c0_i32_0 = arith.constant 0 : i32
    %c0_i32_1 = arith.constant 0 : i32
    return %c0_i32, %c0_i32_0 : i32, i32
  }
  func.func @transform_5(%arg0: i32) -> (i32, i32) {
    %c0_i32 = arith.constant 0 : i32
    %c0_i32_0 = arith.constant 0 : i32
    %c0_i32_1 = arith.constant 0 : i32
    return %c0_i32, %c0_i32_0 : i32, i32
  }
  func.func @transform_6(%arg0: i32) -> (i32, i32) {
    %c0_i32 = arith.constant 0 : i32
    %c0_i32_0 = arith.constant 0 : i32
    %c0_i32_1 = arith.constant 0 : i32
    return %c0_i32, %c0_i32_0 : i32, i32
  }
  func.func @transform_7(%arg0: i32) -> (i32, i32) {
    %c0_i32 = arith.constant 0 : i32
    %c0_i32_0 = arith.constant 0 : i32
    return %c0_i32, %arg0 : i32, i32
  }
}

</mosaic_0001>

<bundles_post_ra>
// kernel: atomic_nn_forward.1
= control target key start
LH: loop header
LB: loop body
LE: loop exit
PB: predicated region body
PF: predicated region fallthrough
CT: control target
= control target key end

     0   :  { %s1161_s0 = inlined_call_operand.vmem [shape: f32[250,16], index: 0, kind: input, shape index: {}]   ;;  %s1162_s1 = inlined_call_operand.vmem [shape: bf16[32,16], index: 1, kind: input, shape index: {}]   ;;  %s1163_s2 = inlined_call_operand.vmem [shape: f32[32,1], index: 2, kind: input, shape index: {}]   ;;  %s1164_s3 = inlined_call_operand.vmem [shape: bf16[32,32], index: 3, kind: input, shape index: {}]   ;;  %s1165_s4 = inlined_call_operand.vmem [shape: f32[32,1], index: 4, kind: input, shape index: {}]   ;;  %s1166_s5 = inlined_call_operand.vmem [shape: f32[32,1], index: 5, kind: input, shape index: {}]   ;;  %s1167_s6 = inlined_call_operand.<no memory space> [shape: f32[1,1], index: 6, kind: input, shape index: {}]   ;;  %s1168_s7 = inlined_call_operand.hbm [shape: f32[1,250], index: 7, kind: output, shape index: {}]  }
   0x1   :  { %v12_v0 = vstv %s1167_s6 }
   0x2   :  { %13 = vst [vmem:[#allocation2] sm:$0x1] %v12_v0 }
   0x3   :  { %14 = vsyncpa [#allocation4], 0 }
   0x4   :  { %16 = vsyncpa [#allocation4 + $0x1], 0  ;;  %s956_s26 = smov 0   ;;  %s958_s27 = smov 0  }
   0x5   :  { %s960_s28 = smov 0   ;;  %s962_s29 = smov 0  }
   0x6 LB: > { %s977_s6 = sadd.s32 4294967295, %s910_s29   ;;  %s725_s30 = sadd.s32 4294967294, %s910_s29   ;;  %s910_s29 = sphi %s962_s29, %s1182_s29   ;;  %s906_s28 = sphi %s960_s28, %s1181_s28   ;;  %s902_s27 = sphi %s958_s27, %s1180_s27   ;;  %s898_s26 = sphi %s956_s26, %s1179_s26  }
   0x7   : > { %s981_s8 = sadd.s32 1, %s910_s29   ;;  %s181_s9 = sadd.s32 1, %s906_s28 }
   0x8   : > { %s178_s10 = ssub.s32 %s910_s29, %s981_s8  ;;  %p191_p0 = scmp.ne.s32.totalorder %s906_s28, %s902_s27 }
   0x9   : > { %p179_p1 = scmp.eq.s32.totalorder %s178_s10, 0  ;;  %p192_p2 = scmp.eq.s32.totalorder %s977_s6, 1 }
   0xa   : > { %p197_p3 = scmp.ne.s32.totalorder %s902_s27, %s898_s26  ;;  %p198_p4 = scmp.eq.s32.totalorder %s725_s30, 1 }
   0xb   : > { %s992_s11 = scalar_select %p179_p1, %s906_s28, %s181_s9  }
   0xc   : > { %p994_p5 = por %p192_p2, %p191_p0  ;;  %p998_p6 = por %p198_p4, %p197_p3 }
   0xd   : > { %p728_p7 = scmp.ge.s32.totalorder %s910_s29, 1  ;;  %p243_p8 = scmp.lt.s32.totalorder %s910_s29, 3 }
   0xf   : > { %p244_p9 = pnand %p728_p7, %p243_p8 }
  0x10   : > { %s729_s14 = sshll.u32 (!%p244_p9), %s977_s6, 4  ;;  %s272_s22 = sand.u32 (!%p244_p9), 1, %s902_s27  }
  0x11   : > { %247 = sbr.rel (%p244_p9) target bundleno = 472 (0x1d8), region = 48  ;;  %p275_p10 = scmp.lt.s32.totalorder (!%p244_p9), %s729_s14, 31 }
  0x12   : > { %s666_s24 = scalar_lea.hbm (!%p244_p9), %s1168_s7, %s977_s6  ;;  %s273_s25 = scalar_lea.vmem (!%p244_p9), [#allocation3], %s272_s22 }
  0x13   : > { %s668_s30 = sshll.u32 (!%p244_p9), %s273_s25, 4  ;;  %s670_s9 = sshll.u32 (!%p244_p9), %s666_s24, 4  ;;  %s669_s30 = int_to_ptr.vmem [resolvable:$true] %s668_s30  ;;  %s671_s9 = int_to_ptr.hbm [resolvable:$true] %s670_s9 }
  0x14   : > { %s658_s10 = scalar_lea.sflag (!%p244_p9), [#allocation4], %s272_s22  ;;  %s868_s17 = scalar_lea.hbm (!%p244_p9), %s1168_s7, 2 }
  0x16   : > { %s1184_s14 = smov (!%p275_p10, %s729_s14), 31  ;;  %vm343_vm0 = vcmask 130048   ;;  %v311_v11 = vld [vmem:[%s1163_s2 + $0x10] sm:$0xff]  ;;  %v912_v13 = vmov 0   ;;  %v312_v17 = vld [vmem:[%s1163_s2 + $0x18] sm:$0xff]  ;;  %v309_v22 = vld [vmem:[%s1163_s2] sm:$0xff] }
  0x17   : > { %s730_s15 = sshll.u32 %s1184_s14, 3  ;;  %813 = vset.pattern.permute.xlu0 %v912_v13  ;;  %814 = vset.pattern.permute.xlu1 %v912_v13  ;;  %v477_v27 = vld [vmem:[%s1165_s4 + $0x10] sm:$0xff]  ;;  %v310_v28 = vld [vmem:[%s1163_s2 + $0x8] sm:$0xff]  ;;  %v478_v34 = vld [vmem:[%s1165_s4 + $0x18] sm:$0xff]  ;;  %s862_s14 = sshra.s32 %s671_s9, 4  ;;  %s863_s14 = int_to_ptr.hbm [resolvable:$true] %s862_s14 }
  0x18   : > { %s1008_s18 = scalar_lea.vmem %s1161_s0, %s730_s15  ;;  %325 = vperm.xlu0 %813, %v311_v11   ;;  %815 = vset.pattern.permute.xlu2 %v912_v13  ;;  %v612_v33 = vld [vmem:[%s1166_s5 + $0x8] sm:$0xff]  ;;  %v648_v39 = vld [vmem:[#allocation2] sm:$0x1]  ;;  %v613_v40 = vld [vmem:[%s1166_s5 + $0x10] sm:$0xff]  ;;  %s864_s15 = scalar_lea.hbm %s863_s14, 1 }
  0x19   : > { %v295_v1 = vld [vmem:[%s1008_s18 + $0x70] sm:$0xff]  ;;  %v296_v2 = vld [vmem:[%s1008_s18 + $0x78] sm:$0xff]  ;;  %v293_v4 = vld [vmem:[%s1008_s18 + $0x60] sm:$0xff]  ;;  %315 = vperm.xlu1 %814, %v309_v22   ;;  %p865_p11 = scmp.ne.s32.totalorder %s863_s14, %s864_s15  ;;  %p869_p0 = scmp.lt.s32.totalorder %s863_s14, %s1168_s7 }
  0x1a   : > { %v304_v3 = vpack.c.bf16 %v296_v2, %v295_v1  ;;  %v294_v5 = vld [vmem:[%s1008_s18 + $0x68] sm:$0xff]  ;;  %v291_v9 = vld [vmem:[%s1008_s18 + $0x50] sm:$0xff]  ;;  %v292_v10 = vld [vmem:[%s1008_s18 + $0x58] sm:$0xff]  ;;  %p870_p1 = scmp.lt.s32.totalorder %s868_s17, %s864_s15 }
  0x1b   : > { %v303_v7 = vpack.c.bf16 %v294_v5, %v293_v4  ;;  %v302_v12 = vpack.c.bf16 %v292_v10, %v291_v9  ;;  %v289_v15 = vld [vmem:[%s1008_s18 + $0x40] sm:$0xff]  ;;  %v290_v16 = vld [vmem:[%s1008_s18 + $0x48] sm:$0xff]  ;;  %v287_v20 = vld [vmem:[%s1008_s18 + $0x30] sm:$0xff]  ;;  %p866_p12 = pnand %p865_p11, %p994_p5 }
  0x1c   : > { %v372_v6 = vsel %vm343_vm0, %v304_v3, 0  ;;  %v301_v18 = vpack.c.bf16 %v290_v16, %v289_v15  ;;  %v288_v21 = vld [vmem:[%s1008_s18 + $0x38] sm:$0xff]  ;;  %v285_v25 = vld [vmem:[%s1008_s18 + $0x20] sm:$0xff]  ;;  %v286_v26 = vld [vmem:[%s1008_s18 + $0x28] sm:$0xff]  ;;  %p871_p2 = por %p870_p1, %p869_p0 }
  0x1d   : > { %374 = vmatpush.bf16.xpose.msra.mxu0 %v372_v6  ;;  %765 = vmatpush.bf16.xpose.msra.mxu2 %v372_v6  ;;  %v369_v8 = vsel %vm343_vm0, %v303_v7, 0  ;;  %v366_v14 = vsel %vm343_vm0, %v302_v12, 0  ;;  %v300_v23 = vpack.c.bf16 %v288_v21, %v287_v20  ;;  %v299_v29 = vpack.c.bf16 %v286_v26, %v285_v25  ;;  %v283_v31 = vld [vmem:[%s1008_s18 + $0x10] sm:$0xff]  ;;  %v284_v32 = vld [vmem:[%s1008_s18 + $0x18] sm:$0xff]  ;;  %v281_v37 = vld [vmem:[%s1008_s18] sm:$0xff]  ;;  %p867_p13 = pneg %p866_p12 }
  0x1e   : > { %v363_v19 = vsel %vm343_vm0, %v301_v18, 0  ;;  %v298_v35 = vpack.c.bf16 %v284_v32, %v283_v31  ;;  %v282_v38 = vld [vmem:[%s1008_s18 + $0x8] sm:$0xff]  ;;  %v761_v43 = vld [vmem:[%s1162_s1] sm:$0xff] }
  0x1f   : > { %v360_v24 = vsel %vm343_vm0, %v300_v23, 0  ;;  %v357_v30 = vsel %vm343_vm0, %v299_v29, 0  ;;  %v297_v41 = vpack.c.bf16 %v282_v38, %v281_v37  ;;  %v762_v44 = vld [vmem:[%s1162_s1 + $0x8] sm:$0xff]  ;;  %p872_p3 = pnand %p871_p2, %p867_p13 }
  0x20   : > { %330 = vperm.xlu0 %813, %v312_v17   ;;  %v354_v36 = vsel %vm343_vm0, %v298_v35, 0 }
  0x21   : > { %320 = vperm.xlu1 %814, %v310_v28   ;;  %v351_v42 = vsel %vm343_vm0, %v297_v41, 0 }
  0x25   : > { %375 = vmatpush.bf16.xpose.msra.mxu0 %v369_v8  ;;  %766 = vmatpush.bf16.xpose.msra.mxu2 %v369_v8 }
  0x28   : > { %491 = vperm.xlu0 %813, %v477_v27  }
  0x29   : > { %496 = vperm.xlu1 %814, %v478_v34  }
  0x2d   : > { %376 = vmatpush.bf16.xpose.msra.mxu0 %v366_v14  ;;  %767 = vmatpush.bf16.xpose.msra.mxu2 %v366_v14 }
  0x30   : > { %622 = vperm.xlu0 %813, %v612_v33  }
  0x31   : > { %627 = vperm.xlu1 %814, %v613_v40  }
  0x35   : > { %377 = vmatpush.bf16.xpose.msra.mxu0 %v363_v19  ;;  %768 = vmatpush.bf16.xpose.msra.mxu2 %v363_v19 }
  0x38   : > { %651 = vperm.xlu0 %813, %v648_v39  }
  0x3d   : > { %378 = vmatpush.bf16.xpose.msra.mxu0 %v360_v24  ;;  %769 = vmatpush.bf16.xpose.msra.mxu2 %v360_v24  ;;  %v475_v24 = vld [vmem:[%s1165_s4] sm:$0xff] }
  0x3e   : > { %481 = vperm.xlu2 %815, %v475_v24  }
  0x45   : > { %379 = vmatpush.bf16.xpose.msra.mxu0 %v357_v30  ;;  %770 = vmatpush.bf16.xpose.msra.mxu2 %v357_v30 }
  0x4d   : > { %380 = vmatpush.bf16.xpose.msra.mxu0 %v354_v36  ;;  %771 = vmatpush.bf16.xpose.msra.mxu2 %v354_v36 }
  0x55   : > { %381 = vmatpush.bf16.xpose.msra.mxu0 %v351_v42  ;;  %772 = vmatpush.bf16.xpose.msra.mxu2 %v351_v42 }
  0x5c   : > { %739 = vmatmul.msk.bf16.vlgmr.msra.gmra.mxu0 %vm343_vm0, %v761_v43  ;;  %740 = vmatmul.msk.bf16.vlgmr.msra.gmra.mxu2 %vm343_vm0, %v762_v44  ;;  %v476_v44 = vld [vmem:[%s1165_s4 + $0x8] sm:$0xff] }
  0x5d   : > { %486 = vperm.xlu2 %815, %v476_v44  }
  0x8a   : > { %v326_v49 = vpop.permute.xlu0 %325 }
  0x8b   : > { %v316_v45 = vpop.permute.xlu1 %315 }
  0x92   : > { %v331_v58 = vpop.permute.xlu0 %330 }
  0x93   : > { %v321_v52 = vpop.permute.xlu1 %320 }
  0xd9   : > { %v383_v46 = vpop.f32.mrf.mxu0 }
  0xda   : > { %v384_v47 = vadd.f32 %v383_v46, %v316_v45 }
  0xdc   : > { %v741_v48 = vmul.f32 -1.442695, %v384_v47 }
  0xde   : > { %816 = vpow2.f32 %v741_v48 }
  0xdf   : > { %v388_v50 = vpop.f32.mrf.mxu2 }
  0xe0   : > { %v389_v51 = vadd.f32 %v388_v50, %v326_v49 }
  0xe1   : > { %v385_v53 = vpop.f32.mrf.mxu0 }
  0xe2   : > { %v743_v54 = vmul.f32 -1.442695, %v389_v51  ;;  %v386_v55 = vadd.f32 %v385_v53, %v321_v52  ;;  %v763_v51 = vld [vmem:[%s1164_s3] sm:$0xff]  ;;  %v614_v53 = vld [vmem:[%s1166_s5 + $0x18] sm:$0xff] }
  0xe3   : > { %v611_v52 = vld [vmem:[%s1166_s5] sm:$0xff] }
  0xe4   : > { %v817_v56 = vpop.eup %816  ;;  %818 = vpow2.f32 %v743_v54  ;;  %v742_v57 = vmul.f32 -1.442695, %v386_v55  ;;  %617 = vperm.xlu2 %815, %v611_v52   ;;  %v764_v54 = vld [vmem:[%s1164_s3 + $0x8] sm:$0xff]  ;;  %v482_v55 = vpop.permute.xlu2 %481 }
  0xe5   : > { %v1066_v59 = vadd.f32 1.0, %v817_v56 }
  0xe6   : > { %820 = vpow2.f32 %v742_v57 }
  0xe7   : > { %v390_v60 = vpop.f32.mrf.mxu2  ;;  %822 = vrcp.f32 %v1066_v59  ;;  %vm414_vm2 = vweird.f32 %v1066_v59  ;;  %v418_v37 = vand.u32 2147483647, %v1066_v59  ;;  %v420_v38 = vand.u32 2147483648, %v1066_v59 }
  0xe8   : > { %v391_v61 = vadd.f32 %v390_v60, %v331_v58 }
  0xe9   : > { %v421_v47 = vor.u32 1.1754944e-38, %v420_v38  ;;  %vm419_vm0 = vcmp.eq.f32.partialorder %v418_v37, 8.507059e+37 }
  0xea   : > { %v819_v62 = vpop.eup %818  ;;  %v744_v63 = vmul.f32 -1.442695, %v391_v61 }
  0xeb   : > { %v407_v0 = vadd.f32 1.0, %v819_v62 }
  0xec   : > { %v821_v1 = vpop.eup %820  ;;  %824 = vpow2.f32 %v744_v63  ;;  %632 = vperm.xlu2 %815, %v614_v53  }
  0xed   : > { %826 = vrcp.f32 %v407_v0  ;;  %v406_v2 = vadd.f32 1.0, %v821_v1  ;;  %v1069_v3 = vpop.eup %822  ;;  %vm444_vm1 = vweird.f32 %v407_v0  ;;  %v448_v21 = vand.u32 2147483647, %v407_v0 }
  0xee   : > { %v410_v10 = vmul.f32 %v1069_v3, %v1066_v59  ;;  %v450_v22 = vand.u32 2147483648, %v407_v0  ;;  %vm415_vm7 = vweird.f32 %v1069_v3  ;;  %v487_v59 = vpop.permute.xlu2 %486 }
  0xef   : > { %828 = vrcp.f32 %v406_v2  ;;  %vm429_vm8 = vweird.f32 %v406_v2  ;;  %v433_v29 = vand.u32 2147483647, %v406_v2  ;;  %v435_v30 = vand.u32 2147483648, %v406_v2  ;;  %vm416_vm14 = vmor %vm414_vm2, %vm415_vm7 }
  0xf0   : > { %v411_v14 = vsub.f32 1.0, %v410_v10  ;;  %v451_v35 = vor.u32 1.1754944e-38, %v450_v22  ;;  %vm449_vm12 = vcmp.eq.f32.partialorder %v448_v21, 8.507059e+37 }
  0xf1   : > { %v436_v43 = vor.u32 1.1754944e-38, %v435_v30  ;;  %vm434_vm15 = vcmp.eq.f32.partialorder %v433_v29, 8.507059e+37 }
  0xf2   : > { %v825_v4 = vpop.eup %824  ;;  %v412_v20 = vmul.f32 %v1069_v3, %v411_v14 }
  0xf3   : > { %v827_v5 = vpop.eup %826  ;;  %v408_v6 = vadd.f32 1.0, %v825_v4 }
  0xf4   : > { %v440_v7 = vmul.f32 %v827_v5, %v407_v0  ;;  %vm445_vm3 = vweird.f32 %v827_v5  ;;  %v413_v33 = vadd.f32 %v1069_v3, %v412_v20  ;;  %v492_v0 = vpop.permute.xlu0 %491 }
  0xf5   : > { %v829_v8 = vpop.eup %828  ;;  %830 = vrcp.f32 %v408_v6  ;;  %v465_v23 = vand.u32 2147483648, %v408_v6  ;;  %v463_v26 = vand.u32 2147483647, %v408_v6  ;;  %vm1079_vm6 = vmor %vm444_vm1, %vm445_vm3  ;;  %vm459_vm9 = vweird.f32 %v408_v6 }
  0xf6   : > { %v441_v9 = vsub.f32 1.0, %v440_v7  ;;  %v425_v11 = vmul.f32 %v829_v8, %v406_v2  ;;  %vm430_vm4 = vweird.f32 %v829_v8  ;;  %v417_v46 = vsel %vm416_vm14, %v1069_v3, %v413_v33  ;;  %v497_v7 = vpop.permute.xlu1 %496 }
  0xf7   : > { %vm1088_vm10 = vmor %vm429_vm8, %vm430_vm4  ;;  %v466_v36 = vor.u32 1.1754944e-38, %v465_v23  ;;  %vm464_vm13 = vcmp.eq.f32.partialorder %v463_v26, 8.507059e+37  ;;  %v422_v49 = vsel %vm419_vm0, %v421_v47, %v417_v46  ;;  %vm509_vm1 = vcmask 261120  }
  0xf8   : > { %v426_v12 = vsub.f32 1.0, %v425_v11  ;;  %v442_v13 = vmul.f32 %v827_v5, %v441_v9 }
  0xfa   : > { %v427_v17 = vmul.f32 %v829_v8, %v426_v12  ;;  %v443_v18 = vadd.f32 %v827_v5, %v442_v13 }
  0xfb   : > { %v831_v15 = vpop.eup %830 }
  0xfc   : > { %v455_v16 = vmul.f32 %v831_v15, %v408_v6  ;;  %vm460_vm5 = vweird.f32 %v831_v15  ;;  %v428_v27 = vadd.f32 %v829_v8, %v427_v17  ;;  %v447_v31 = vsel %vm1079_vm6, %v827_v5, %v443_v18 }
  0xfd   : > { %vm461_vm11 = vmor %vm459_vm9, %vm460_vm5  ;;  %v452_v41 = vsel %vm449_vm12, %v451_v35, %v447_v31 }
  0xfe   : > { %v456_v19 = vsub.f32 1.0, %v455_v16  ;;  %v432_v40 = vsel %vm1088_vm10, %v829_v8, %v428_v27 }
  0xff   : > { %v437_v48 = vsel %vm434_vm15, %v436_v43, %v432_v40 }
 0x100   : > { %v457_v25 = vmul.f32 %v831_v15, %v456_v19  ;;  %v473_v50 = vpack.c.bf16 %v437_v48, %v422_v49  ;;  %v623_v49 = vpop.permute.xlu0 %622 }
 0x102   : > { %v458_v32 = vadd.f32 %v831_v15, %v457_v25 }
 0x104   : > { %v462_v39 = vsel %vm461_vm11, %v831_v15, %v458_v32 }
 0x105   : > { %v467_v42 = vsel %vm464_vm13, %v466_v36, %v462_v39 }
 0x106   : > { %v474_v45 = vpack.c.bf16 %v467_v42, %v452_v41 }
 0x108   : > { %522 = vmatpush.bf16.msra.mxu1 %v474_v45 }
 0x10c   : > { %523 = vmatpush.bf16.msra.mxu1 %v473_v50 }
 0x10f   : > { %753 = vmatmul.msk.bf16.vlgmr.msra.gmra.mxu1 %vm509_vm1, %v763_v51 }
 0x11f   : > { %754 = vmatmul.msk.bf16.gmra.mxu1 %vm509_vm1, %v764_v54 }
 0x13e   : > { %v618_v40 = vpop.permute.xlu2 %617 }
 0x18c   : > { %v525_v56 = vpop.f32.mrf.mxu1 }
 0x18d   : > { %v526_v57 = vadd.f32 %v525_v56, %v482_v55  ;;  %v628_v56 = vpop.permute.xlu1 %627 }
 0x18f   : > { %v755_v58 = vmul.f32 -1.442695, %v526_v57 }
 0x191   : > { %832 = vpow2.f32 %v755_v58 }
 0x194   : > { %v527_v60 = vpop.f32.mrf.mxu1 }
 0x195   : > { %v528_v61 = vadd.f32 %v527_v60, %v487_v59 }
 0x197   : > { %v756_v62 = vmul.f32 -1.442695, %v528_v61  ;;  %v833_v63 = vpop.eup %832 }
 0x198   : > { %v547_v1 = vadd.f32 1.0, %v833_v63  ;;  %v633_v63 = vpop.permute.xlu2 %632 }
 0x199   : > { %834 = vpow2.f32 %v756_v62 }
 0x19a   : > { %836 = vrcp.f32 %v547_v1  ;;  %vm556_vm6 = vweird.f32 %v547_v1  ;;  %v560_v31 = vand.u32 2147483647, %v547_v1  ;;  %v562_v32 = vand.u32 2147483648, %v547_v1 }
 0x19c   : > { %v530_v2 = vpop.f32.mrf.mxu1  ;;  %v563_v45 = vor.u32 1.1754944e-38, %v562_v32  ;;  %vm561_vm12 = vcmp.eq.f32.partialorder %v560_v31, 8.507059e+37 }
 0x19d   : > { %v531_v3 = vadd.f32 %v530_v2, %v492_v0 }
 0x19f   : > { %v835_v4 = vpop.eup %834  ;;  %v757_v5 = vmul.f32 -1.442695, %v531_v3 }
 0x1a0   : > { %v548_v6 = vadd.f32 1.0, %v835_v4  ;;  %v837_v10 = vpop.eup %836 }
 0x1a1   : > { %838 = vpow2.f32 %v757_v5  ;;  %v552_v15 = vmul.f32 %v837_v10, %v547_v1  ;;  %vm557_vm3 = vweird.f32 %v837_v10 }
 0x1a2   : > { %840 = vrcp.f32 %v548_v6  ;;  %vm571_vm4 = vweird.f32 %v548_v6  ;;  %v577_v27 = vand.u32 2147483648, %v548_v6  ;;  %v575_v29 = vand.u32 2147483647, %v548_v6  ;;  %vm1121_vm8 = vmor %vm556_vm6, %vm557_vm3 }
 0x1a3   : > { %v553_v18 = vsub.f32 1.0, %v552_v15 }
 0x1a4   : > { %v532_v8 = vpop.f32.mrf.mxu1  ;;  %v578_v41 = vor.u32 1.1754944e-38, %v577_v27  ;;  %vm576_vm11 = vcmp.eq.f32.partialorder %v575_v29, 8.507059e+37 }
 0x1a5   : > { %v533_v9 = vadd.f32 %v532_v8, %v497_v7  ;;  %v554_v23 = vmul.f32 %v837_v10, %v553_v18  ;;  %v652_v8 = vpop.permute.xlu0 %651 }
 0x1a7   : > { %v839_v11 = vpop.eup %838  ;;  %v758_v12 = vmul.f32 -1.442695, %v533_v9  ;;  %v555_v28 = vadd.f32 %v837_v10, %v554_v23 }
 0x1a8   : > { %v841_v13 = vpop.eup %840  ;;  %v549_v14 = vadd.f32 1.0, %v839_v11 }
 0x1a9   : > { %v567_v16 = vmul.f32 %v841_v13, %v548_v6  ;;  %842 = vpow2.f32 %v758_v12  ;;  %vm572_vm2 = vweird.f32 %v841_v13  ;;  %v559_v42 = vsel %vm1121_vm8, %v837_v10, %v555_v28 }
 0x1aa   : > { %844 = vrcp.f32 %v549_v14  ;;  %vm1117_vm7 = vmor %vm571_vm4, %vm572_vm2  ;;  %v592_v34 = vand.u32 2147483648, %v549_v14  ;;  %vm586_vm9 = vweird.f32 %v549_v14  ;;  %v590_v38 = vand.u32 2147483647, %v549_v14 }
 0x1ab   : > { %v568_v17 = vsub.f32 1.0, %v567_v16  ;;  %v564_v50 = vsel %vm561_vm12, %v563_v45, %v559_v42  ;;  %v654_v10 = vperm.slane %v652_v8, 0 }
 0x1ac   : > { %v593_v47 = vor.u32 1.1754944e-38, %v592_v34  ;;  %vm591_vm13 = vcmp.eq.f32.partialorder %v590_v38, 8.507059e+37  ;;  %v635_v57 = vmul.f32 %v618_v40, %v564_v50 }
 0x1ad   : > { %v569_v20 = vmul.f32 %v841_v13, %v568_v17 }
 0x1af   : > { %v843_v19 = vpop.eup %842  ;;  %v570_v25 = vadd.f32 %v841_v13, %v569_v20 }
 0x1b0   : > { %v845_v21 = vpop.eup %844  ;;  %v550_v22 = vadd.f32 1.0, %v843_v19 }
 0x1b1   : > { %v582_v24 = vmul.f32 %v845_v21, %v549_v14  ;;  %vm587_vm5 = vweird.f32 %v845_v21  ;;  %v574_v36 = vsel %vm1117_vm7, %v841_v13, %v570_v25 }
 0x1b2   : > { %846 = vrcp.f32 %v550_v22  ;;  %vm588_vm10 = vmor %vm586_vm9, %vm587_vm5  ;;  %v579_v46 = vsel %vm576_vm11, %v578_v41, %v574_v36  ;;  %v607_v51 = vand.u32 2147483648, %v550_v22  ;;  %v605_v54 = vand.u32 2147483647, %v550_v22 }
 0x1b3   : > { %v583_v26 = vsub.f32 1.0, %v582_v24  ;;  %v636_v55 = vmul.f32 %v623_v49, %v579_v46  ;;  %vm601_vm15 = vweird.f32 %v550_v22 }
 0x1b4   : > { %v608_v60 = vor.u32 1.1754944e-38, %v607_v51  ;;  %vm606_vm1 = vcmp.eq.f32.partialorder %v605_v54, 8.507059e+37 }
 0x1b5   : > { %v584_v30 = vmul.f32 %v845_v21, %v583_v26  ;;  %v639_v62 = vadd.f32 %v636_v55, %v635_v57 }
 0x1b7   : > { %v585_v37 = vadd.f32 %v845_v21, %v584_v30 }
 0x1b8   : > { %v847_v39 = vpop.eup %846 }
 0x1b9   : > { %v589_v43 = vsel %vm588_vm10, %v845_v21, %v585_v37  ;;  %v597_v44 = vmul.f32 %v847_v39, %v550_v22  ;;  %vm602_vm14 = vweird.f32 %v847_v39 }
 0x1ba   : > { %v594_v52 = vsel %vm591_vm13, %v593_v47, %v589_v43  ;;  %vm603_vm0 = vmor %vm601_vm15, %vm602_vm14 }
 0x1bb   : > { %v598_v48 = vsub.f32 1.0, %v597_v44  ;;  %v637_v59 = vmul.f32 %v628_v56, %v594_v52 }
 0x1bd   : > { %v599_v53 = vmul.f32 %v847_v39, %v598_v48  ;;  %v640_v2 = vadd.f32 %v639_v62, %v637_v59 }
 0x1bf   : > { %v600_v58 = vadd.f32 %v847_v39, %v599_v53 }
 0x1c1   : > { %v604_v61 = vsel %vm603_vm0, %v847_v39, %v600_v58 }
 0x1c2   : > { %v609_v0 = vsel %vm606_vm1, %v608_v60, %v604_v61 }
 0x1c3   : > { %v638_v1 = vmul.f32 %v633_v63, %v609_v0 }
 0x1c5   : > { %v641_v3 = vadd.f32 %v640_v2, %v638_v1 }
 0x1c7   : > { %v642_v4 = vrot.slane %v641_v3, 4 }
 0x1c9   : > { %v643_v5 = vadd.f32 %v642_v4, %v641_v3 }
 0x1cb   : > { %v644_v6 = vrot.slane %v643_v5, 2 }
 0x1cd   : > { %v645_v7 = vadd.f32 %v644_v6, %v643_v5 }
 0x1cf   : > { %v646_v9 = vrot.slane %v645_v7, 1 }
 0x1d1   : > { %v647_v11 = vadd.f32 %v646_v9, %v645_v7 }
 0x1d3   : > { %v655_v12 = vadd.f32 %v654_v10, %v647_v11 }
 0x1d5   : > { %656 = vst [vmem:[%s273_s25] sm:$0x1] %v655_v12 }
 0x1d6   : > { %875 = shalt.err (!%p872_p3)
}
 0x1d7   : > { %773 = dma.vmem_to_hbm [thread:$0]  (%p994_p5), %s669_s30, 16, %s671_s9, %s658_s10  }
 0x1d8 PF: > { %p779_p4 = scmp.ge.s32.totalorder %s910_s29, 2  ;;  %s682_s21 = sand.u32 1, %s898_s26  }
 0x1d9   : > { %s683_s22 = scalar_lea.sflag [#allocation4], %s682_s21 }
 0x1da   : > { %p776_p7 = pnand %p779_p4, %p998_p6 }
 0x1dc   : > { %p777_p8 = pneg %p776_p7 }
 0x1de   : > { %893 = dma.done.wait (%p777_p8), %s683_s22, 16  }
 0x1df   : > { %895 = vsyncadd (%p777_p8), %s683_s22, 4294967280  ;;  %p19_p9 = scmp.ge.s32.totalorder %s981_s8, 4   ;;  %s1179_s26 = smov %s902_s27 }
 0x1e0   : > { %s1180_s27 = smov %s906_s28  ;;  %s1181_s28 = smov %s992_s11 }
 0x1e1   : > { %s1182_s29 = smov %s981_s8  ;;  %21 = sbr.rel (!%p19_p9) target bundleno = 6 (0x6), region = 83 }
 0x1e6   :  { %688 = vsyncpa [#allocation4], 1 }
 0x1e7   :  { %690 = vsyncpa [#allocation4 + $0x1], 1 }

</bundles_post_ra>
